<compile_context>
chip_gen: v7x
topology: tpu7x:2x2x1
jax: 0.10.0
libtpu: 0.0.40
codegen_flags: <defaults>
</compile_context>

<pallas_src>
import functools

import jax
import jax.numpy as jnp
from jax.experimental import pallas as pl
from jax.experimental.pallas import tpu as pltpu

LOW_THRESHOLD = 312.7
HIGH_THRESHOLD = 625.3

# Deterministic "parameter" from __init__ (unused by forward; kept for parity).
CLASS_WEIGHTS = jnp.array([1.0 / 3.0, 1.0 / 3.0, 1.0 / 3.0], dtype=jnp.float32)

LANES = 128
BLOCK_ROWS = 8192  # (8192, 128) f32 tile = 4 MiB; 2 inputs x 2 bufs = 16 MiB VMEM.


def _wmse_stats_kernel(p_ref, t_ref, out_ref, *, n_rows):
    """Writes one lane-dense (8, 128) partial-stats tile per grid block.

    Plane layout (sublane index):
      0/1/2 : per-lane partial sum of squared error (low / medium / high)
      3/4/5 : per-lane partial element counts     (low / medium / high)
      6/7   : zero padding (keeps the store a full aligned (8, 128) tile)
    """
    block_rows, lanes = p_ref.shape

    # Stream in native dtype; cast to f32 on the VPU (hidden under DMA;
    # no-op for f32 inputs).
    p = p_ref[...].astype(jnp.float32)
    t = t_ref[...].astype(jnp.float32)

    diff = p - t
    sq = diff * diff

    # Medium mask is computed exactly as in the reference ((t>L) & (t<H)) so
    # NaN targets fall into no class, matching PyTorch semantics.
    low = t <= LOW_THRESHOLD
    med = (t > LOW_THRESHOLD) & (t < HIGH_THRESHOLD)
    high = t >= HIGH_THRESHOLD

    pad_planes = jnp.zeros((2, lanes), jnp.float32)

    def emit(low_m, med_m, high_m):
        def lane_sum(x):  # (block_rows, 128) -> (1, 128)
            return jnp.sum(x, axis=0, keepdims=True)

        stats = jnp.concatenate(
            [
                lane_sum(jnp.where(low_m, sq, 0.0)),
                lane_sum(jnp.where(med_m, sq, 0.0)),
                lane_sum(jnp.where(high_m, sq, 0.0)),
                lane_sum(low_m.astype(jnp.float32)),
                lane_sum(med_m.astype(jnp.float32)),
                lane_sum(high_m.astype(jnp.float32)),
                pad_planes,
            ],
            axis=0,
        )
        out_ref[0] = stats  # single aligned (8, 128) store

    tail_rows = n_rows % block_rows  # static (trace-time) Python int
    if tail_rows == 0:
        # Every grid block is full: no validity masking anywhere (fast path).
        emit(low, med, high)
    else:
        i = pl.program_id(0)
        last = pl.num_programs(0) - 1

        @pl.when(i != last)
        def _():
            emit(low, med, high)

        @pl.when(i == last)
        def _():
            # Only the final block carries undefined padded rows; mask them
            # with a row-only iota compare against a static bound (no flat
            # element index -> no int32 overflow risk for huge inputs).
            row_idx = jax.lax.broadcasted_iota(jnp.int32, (block_rows, lanes), 0)
            valid = row_idx < tail_rows
            emit(low & valid, med & valid, high & valid)


def _round_up(x, m):
    return (x + m - 1) // m * m


@jax.jit
def weighted_mse_loss(predictions, targets):
    p = predictions.reshape(-1)
    t = targets.reshape(-1)
    n = p.shape[0]
    if n == 0:
        return jnp.float32(0.0)

    rows = n // LANES
    tail = n - rows * LANES

    if rows > 0:
        if rows > 8:
            # Aim for >= 2 grid blocks (v7x megacore) while keeping blocks
            # sublane-aligned (multiple of 8 rows) and <= BLOCK_ROWS.
            target_rows = min(BLOCK_ROWS, _round_up(pl.cdiv(rows, 2), 8))
            block_rows = target_rows if target_rows < rows else rows
        else:
            block_rows = rows  # single full block (shape == full dim)
        num_blocks = pl.cdiv(rows, block_rows)

        # Aligned prefix (no-op slice when n is lane-aligned).
        p2 = p[: rows * LANES].reshape(rows, LANES)
        t2 = t[: rows * LANES].reshape(rows, LANES)

        kernel = functools.partial(_wmse_stats_kernel, n_rows=rows)
        partials = pl.pallas_call(
            kernel,
            out_shape=jax.ShapeDtypeStruct((num_blocks, 8, LANES), jnp.float32),
            grid=(num_blocks,),
            in_specs=[
                pl.BlockSpec((block_rows, LANES), lambda i: (i, 0)),
                pl.BlockSpec((block_rows, LANES), lambda i: (i, 0)),
            ],
            out_specs=pl.BlockSpec((1, 8, LANES), lambda i: (i, 0, 0)),
            compiler_params=pltpu.CompilerParams(
                dimension_semantics=("parallel",),
                vmem_limit_bytes=32 * 1024 * 1024,
            ),
        )(p2, t2)

        # Tiny final tree-reduction over blocks/lanes in the wrapper.
        sums = jnp.sum(partials[:, 0:3, :], axis=(0, 2))  # (3,) per-class SSE
        # Per-block per-lane counts are exact integers <= block_rows in f32;
        # cast to int32 before summing so totals stay exact beyond 2^24.
        counts = jnp.sum(partials[:, 3:6, :].astype(jnp.int32), axis=(0, 2))
    else:
        sums = jnp.zeros((3,), jnp.float32)
        counts = jnp.zeros((3,), jnp.int32)

    if tail:
        # < 128 leftover elements: fold in with plain jnp (negligible cost,
        # avoids padding/copying the big inputs).
        pt = p[rows * LANES:].astype(jnp.float32)
        tt = t[rows * LANES:].astype(jnp.float32)
        sqt = (pt - tt) ** 2
        low_t = tt <= LOW_THRESHOLD
        med_t = (tt > LOW_THRESHOLD) & (tt < HIGH_THRESHOLD)
        high_t = tt >= HIGH_THRESHOLD
        sums = sums + jnp.stack(
            [
                jnp.sum(jnp.where(low_t, sqt, 0.0)),
                jnp.sum(jnp.where(med_t, sqt, 0.0)),
                jnp.sum(jnp.where(high_t, sqt, 0.0)),
            ]
        )
        counts = counts + jnp.stack(
            [jnp.sum(low_t), jnp.sum(med_t), jnp.sum(high_t)]
        ).astype(jnp.int32)

    has_class = counts > 0
    safe_counts = jnp.where(has_class, counts, 1).astype(jnp.float32)
    per_class_mse = jnp.where(has_class, sums / safe_counts, 0.0)
    class_count = jnp.sum(has_class.astype(jnp.float32))
    return jnp.where(
        class_count > 0, jnp.sum(per_class_mse) / class_count, jnp.float32(0.0)
    )


def _reference(predictions, targets):
    p = jnp.asarray(predictions, jnp.float32).reshape(-1)
    t = jnp.asarray(targets, jnp.float32).reshape(-1)
    low = t <= LOW_THRESHOLD
    med = (t > LOW_THRESHOLD) & (t < HIGH_THRESHOLD)
    high = t >= HIGH_THRESHOLD
    sq = (p - t) ** 2
    loss = jnp.float32(0.0)
    cc = 0
    for m in (low, med, high):
        cnt = int(jnp.sum(m))
        if cnt > 0:
            loss = loss + jnp.sum(jnp.where(m, sq, 0.0)) / cnt
            cc += 1
    return loss / cc if cc > 0 else jnp.float32(0.0)


if __name__ == "__main__":
    key = jax.random.PRNGKey(0)
    k1, k2, k3, k4, k5, k6 = jax.random.split(key, 6)

    # Small shapes consistent with a regression loss over model outputs.
    targets = jax.random.uniform(
        k1, (2, 4, 16, 16), jnp.float32, minval=0.0, maxval=900.0
    )
    predictions = targets + 10.0 * jax.random.normal(k2, (2, 4, 16, 16), jnp.float32)
    loss = weighted_mse_loss(predictions, targets)
    jax.block_until_ready(loss)
    ref = _reference(predictions, targets)
    assert jnp.allclose(loss, ref, rtol=1e-5, atol=1e-5), (loss, ref)

    # Lane-unaligned element count exercises the wrapper-side tail fold.
    t2 = jax.random.uniform(k3, (7, 19), jnp.float32, minval=0.0, maxval=900.0)
    p2 = t2 + 10.0 * jax.random.normal(k4, (7, 19), jnp.float32)
    loss2 = weighted_mse_loss(p2, t2)
    jax.block_until_ready(loss2)
    ref2 = _reference(p2, t2)
    assert jnp.allclose(loss2, ref2, rtol=1e-5, atol=1e-5), (loss2, ref2)

    # Row count not divisible by block_rows exercises the in-kernel masked
    # last-block path (9 rows -> blocks of 8 + 1 partial).
    t3 = jax.random.uniform(k5, (9, 128), jnp.float32, minval=0.0, maxval=900.0)
    p3 = t3 + 10.0 * jax.random.normal(k6, (9, 128), jnp.float32)
    loss3 = weighted_mse_loss(p3, t3)
    jax.block_until_ready(loss3)
    ref3 = _reference(p3, t3)
    assert jnp.allclose(loss3, ref3, rtol=1e-5, atol=1e-5), (loss3, ref3)

    print("KERNEL_OK")
</pallas_src>

<mosaic_0001>
module attributes {stable_mosaic.version = 11 : i64} {
  func.func @_wmse_stats_kernel(%arg0: i32, %arg1: memref<8x128xf32, #tpu.memory_space<vmem>>, %arg2: memref<8x128xf32, #tpu.memory_space<vmem>>, %arg3: memref<1x8x128xf32, #tpu.memory_space<vmem>>) attributes {dimension_semantics = [#tpu.dimension_semantics<parallel>], iteration_bounds = array<i64: 2>, scalar_prefetch = 0 : i64, scratch_operands = 0 : i64, tpu.core_type = #tpu.core_type<tc>, window_params = [{transform_indices = @transform_0, window_bounds = array<i64: 8, 128>}, {transform_indices = @transform_1, window_bounds = array<i64: 8, 128>}, {transform_indices = @transform_2, window_bounds = array<i64: 1, 8, 128>}]} {
    %c0 = arith.constant 0 : index
    %c0_0 = arith.constant 0 : index
    %0 = vector.load %arg1[%c0, %c0_0] : memref<8x128xf32, #tpu.memory_space<vmem>>, vector<8x128xf32>
    %c0_1 = arith.constant 0 : index
    %c0_2 = arith.constant 0 : index
    %1 = vector.load %arg2[%c0_1, %c0_2] : memref<8x128xf32, #tpu.memory_space<vmem>>, vector<8x128xf32>
    %2 = arith.subf %0, %1 : vector<8x128xf32>
    %3 = arith.mulf %2, %2 : vector<8x128xf32>
    %cst = arith.constant 3.127000e+02 : f32
    %4 = vector.broadcast %cst : f32 to vector<8x128xf32>
    %5 = arith.cmpf ole, %1, %4 : vector<8x128xf32>
    %cst_3 = arith.constant 3.127000e+02 : f32
    %6 = vector.broadcast %cst_3 : f32 to vector<8x128xf32>
    %7 = arith.cmpf ogt, %1, %6 : vector<8x128xf32>
    %cst_4 = arith.constant 6.253000e+02 : f32
    %8 = vector.broadcast %cst_4 : f32 to vector<8x128xf32>
    %9 = arith.cmpf olt, %1, %8 : vector<8x128xf32>
    %10 = arith.andi %7, %9 : vector<8x128xi1>
    %cst_5 = arith.constant 6.253000e+02 : f32
    %11 = vector.broadcast %cst_5 : f32 to vector<8x128xf32>
    %12 = arith.cmpf oge, %1, %11 : vector<8x128xf32>
    %cst_6 = arith.constant 0.000000e+00 : f32
    %13 = vector.broadcast %cst_6 : f32 to vector<2x128xf32>
    %cst_7 = arith.constant 0.000000e+00 : f32
    %14 = vector.broadcast %cst_7 : f32 to vector<8x128xf32>
    %15 = arith.select %5, %3, %14 : vector<8x128xi1>, vector<8x128xf32>
    %cst_8 = arith.constant dense<0.000000e+00> : vector<128xf32>
    %16 = vector.multi_reduction <add>, %15, %cst_8 [0] : vector<8x128xf32> to vector<128xf32>
    %17 = vector.shape_cast %16 : vector<128xf32> to vector<1x128xf32>
    %cst_9 = arith.constant 0.000000e+00 : f32
    %18 = vector.broadcast %cst_9 : f32 to vector<8x128xf32>
    %19 = arith.select %10, %3, %18 : vector<8x128xi1>, vector<8x128xf32>
    %cst_10 = arith.constant dense<0.000000e+00> : vector<128xf32>
    %20 = vector.multi_reduction <add>, %19, %cst_10 [0] : vector<8x128xf32> to vector<128xf32>
    %21 = vector.shape_cast %20 : vector<128xf32> to vector<1x128xf32>
    %cst_11 = arith.constant 0.000000e+00 : f32
    %22 = vector.broadcast %cst_11 : f32 to vector<8x128xf32>
    %23 = arith.select %12, %3, %22 : vector<8x128xi1>, vector<8x128xf32>
    %cst_12 = arith.constant dense<0.000000e+00> : vector<128xf32>
    %24 = vector.multi_reduction <add>, %23, %cst_12 [0] : vector<8x128xf32> to vector<128xf32>
    %25 = vector.shape_cast %24 : vector<128xf32> to vector<1x128xf32>
    %26 = arith.extui %5 : vector<8x128xi1> to vector<8x128xi32>
    %27 = arith.sitofp %26 : vector<8x128xi32> to vector<8x128xf32>
    %cst_13 = arith.constant dense<0.000000e+00> : vector<128xf32>
    %28 = vector.multi_reduction <add>, %27, %cst_13 [0] : vector<8x128xf32> to vector<128xf32>
    %29 = vector.shape_cast %28 : vector<128xf32> to vector<1x128xf32>
    %30 = arith.extui %10 : vector<8x128xi1> to vector<8x128xi32>
    %31 = arith.sitofp %30 : vector<8x128xi32> to vector<8x128xf32>
    %cst_14 = arith.constant dense<0.000000e+00> : vector<128xf32>
    %32 = vector.multi_reduction <add>, %31, %cst_14 [0] : vector<8x128xf32> to vector<128xf32>
    %33 = vector.shape_cast %32 : vector<128xf32> to vector<1x128xf32>
    %34 = arith.extui %12 : vector<8x128xi1> to vector<8x128xi32>
    %35 = arith.sitofp %34 : vector<8x128xi32> to vector<8x128xf32>
    %cst_15 = arith.constant dense<0.000000e+00> : vector<128xf32>
    %36 = vector.multi_reduction <add>, %35, %cst_15 [0] : vector<8x128xf32> to vector<128xf32>
    %37 = vector.shape_cast %36 : vector<128xf32> to vector<1x128xf32>
    %38 = tpu.concatenate %17, %21, %25, %29, %33, %37, %13 in 0 : vector<1x128xf32>, vector<1x128xf32>, vector<1x128xf32>, vector<1x128xf32>, vector<1x128xf32>, vector<1x128xf32>, vector<2x128xf32> -> vector<8x128xf32>
    %c0_16 = arith.constant 0 : index
    %c0_17 = arith.constant 0 : index
    %c0_18 = arith.constant 0 : index
    %39 = vector.load %arg3[%c0_16, %c0_17, %c0_18] : memref<1x8x128xf32, #tpu.memory_space<vmem>>, vector<1x8x128xf32>
    %40 = vector.shape_cast %39 : vector<1x8x128xf32> to vector<8x128xf32>
    %41 = vector.shape_cast %38 : vector<8x128xf32> to vector<1x8x128xf32>
    tpu.vector_store %arg3[%c0_16, %c0_17, %c0_18], %41 {strides = array<i32>} : memref<1x8x128xf32, #tpu.memory_space<vmem>>, vector<1x8x128xf32>,
    return
  }
  func.func @transform_0(%arg0: i32) -> (i32, i32) {
    %c0_i32 = arith.constant 0 : i32
    %c0_i32_0 = arith.constant 0 : i32
    return %arg0, %c0_i32 : i32, i32
  }
  func.func @transform_1(%arg0: i32) -> (i32, i32) {
    %c0_i32 = arith.constant 0 : i32
    %c0_i32_0 = arith.constant 0 : i32
    return %arg0, %c0_i32 : i32, i32
  }
  func.func @transform_2(%arg0: i32) -> (i32, i32, i32) {
    %c0_i32 = arith.constant 0 : i32
    %c0_i32_0 = arith.constant 0 : i32
    %c0_i32_1 = arith.constant 0 : i32
    return %arg0, %c0_i32, %c0_i32_0 : i32, i32, i32
  }
}

</mosaic_0001>

<bundles_post_ra>
// kernel: weighted_mse_loss.1
= control target key start
LH: loop header
LB: loop body
LE: loop exit
PB: predicated region body
PF: predicated region fallthrough
CT: control target
= control target key end

     0   :  { %s334_s9 = smov 0   ;;  %s359_s0 = inlined_call_operand.vmem [shape: f32[16,128], index: 0, kind: input, shape index: {}]   ;;  %s360_s1 = inlined_call_operand.vmem [shape: f32[16,128], index: 1, kind: input, shape index: {}]   ;;  %s361_s2 = inlined_call_operand.vmem [shape: f32[2,8,128], index: 2, kind: output, shape index: {}]  }
   0x1 LB: > { %s288_s10 = sadd.s32 4294967295, %s316_s9   ;;  %p292_p0 = scmp.ge.s32.totalorder %s316_s9, 1  ;;  %s316_s9 = sphi %s334_s9, %s12_s9  }
   0x2   : > { %p120_p1 = scmp.lt.s32.totalorder %s316_s9, 3 }
   0x4   : > { %p121_p2 = pnand %p292_p0, %p120_p1 }
   0x5   : > { %p144_p3 = scmp.lt.s32.totalorder (!%p121_p2), %s288_s10, 1  ;;  %v318_v3 = vmov (!%p121_p2), 0.0   ;;  %vm210_vm5 = vcmask (!%p121_p2), 1040384   ;;  %vm212_vm6 = vcmask (!%p121_p2), 1041408   ;;  %vm214_vm7 = vcmask (!%p121_p2), 1042432  }
   0x6   : > { %124 = sbr.rel (%p121_p2) target bundleno = 42 (0x2a), region = 28  ;;  %vm216_vm8 = vcmask (!%p121_p2), 1043456   ;;  %vm218_vm9 = vcmask (!%p121_p2), 1044480   ;;  %vm220_vm10 = vcmask (!%p121_p2), 1045504  }
   0xd   : > { %s363_s10 = smov (!%p144_p3, %s288_s10), 1 }
   0xe   : > { %s342_s11 = sshll.u32 %s363_s10, 3 }
   0xf   : > { %s147_s14 = scalar_lea.vmem %s359_s0, %s342_s11  ;;  %s151_s17 = scalar_lea.vmem %s360_s1, %s342_s11 }
  0x10   : > { %v156_v0 = vld [vmem:[%s147_s14] sm:$0xff]  ;;  %s155_s20 = scalar_lea.vmem %s361_s2, %s342_s11 }
  0x11   : > { %v157_v1 = vld [vmem:[%s151_s17] sm:$0xff] }
  0x12   : > { %v158_v2 = vsub.f32 %v156_v0, %v157_v1  ;;  %vm160_vm0 = vcmp.le.f32.partialorder %v157_v1, 312.7  ;;  %vm161_vm1 = vcmp.gt.f32.partialorder %v157_v1, 312.7  ;;  %vm162_vm2 = vcmp.lt.f32.partialorder %v157_v1, 625.3 }
  0x13   : > { %vm163_vm3 = vmand %vm161_vm1, %vm162_vm2  ;;  %vm164_vm4 = vcmp.ge.f32.partialorder %v157_v1, 625.3  ;;  %v296_v4 = vsel %vm160_vm0, 1.0, %v318_v3 }
  0x14   : > { %v159_v5 = vmul.f32 %v158_v2, %v158_v2  ;;  %v188_v6 = vrot.slane %v296_v4, 4  ;;  %v297_v7 = vsel %vm163_vm3, 1.0, %v318_v3  ;;  %v298_v8 = vsel %vm164_vm4, 1.0, %v318_v3 }
  0x15   : > { %v196_v9 = vrot.slane %v297_v7, 4  ;;  %v204_v10 = vrot.slane %v298_v8, 4 }
  0x16   : > { %v165_v11 = vsel %vm160_vm0, %v159_v5, 0.0  ;;  %v172_v12 = vsel %vm163_vm3, %v159_v5, 0.0  ;;  %v179_v13 = vsel %vm164_vm4, %v159_v5, 0.0  ;;  %v189_v14 = vadd.f32 %v296_v4, %v188_v6 }
  0x17   : > { %v166_v15 = vrot.slane %v165_v11, 4  ;;  %v173_v16 = vrot.slane %v172_v12, 4  ;;  %v180_v17 = vrot.slane %v179_v13, 4  ;;  %v197_v18 = vadd.f32 %v297_v7, %v196_v9 }
  0x18   : > { %v190_v19 = vrot.slane %v189_v14, 2  ;;  %v205_v20 = vadd.f32 %v298_v8, %v204_v10 }
  0x19   : > { %v167_v21 = vadd.f32 %v166_v15, %v165_v11  ;;  %v174_v22 = vadd.f32 %v173_v16, %v172_v12  ;;  %v181_v23 = vadd.f32 %v180_v17, %v179_v13  ;;  %v198_v24 = vrot.slane %v197_v18, 2 }
  0x1a   : > { %v191_v25 = vadd.f32 %v190_v19, %v189_v14  ;;  %v206_v26 = vrot.slane %v205_v20, 2 }
  0x1b   : > { %v168_v27 = vrot.slane %v167_v21, 2  ;;  %v175_v28 = vrot.slane %v174_v22, 2  ;;  %v182_v29 = vrot.slane %v181_v23, 2  ;;  %v199_v30 = vadd.f32 %v198_v24, %v197_v18 }
  0x1c   : > { %v207_v31 = vadd.f32 %v206_v26, %v205_v20  ;;  %v192_v35 = vrot.slane %v191_v25, 1 }
  0x1d   : > { %v169_v32 = vadd.f32 %v168_v27, %v167_v21  ;;  %v176_v33 = vadd.f32 %v175_v28, %v174_v22  ;;  %v183_v34 = vadd.f32 %v182_v29, %v181_v23  ;;  %v200_v36 = vrot.slane %v199_v30, 1 }
  0x1e   : > { %v208_v40 = vrot.slane %v207_v31, 1  ;;  %v193_v44 = vadd.f32 %v192_v35, %v191_v25 }
  0x1f   : > { %v170_v37 = vrot.slane %v169_v32, 1  ;;  %v177_v38 = vrot.slane %v176_v33, 1  ;;  %v184_v39 = vrot.slane %v183_v34, 1  ;;  %v201_v45 = vadd.f32 %v200_v36, %v199_v30 }
  0x20   : > { %v209_v46 = vadd.f32 %v208_v40, %v207_v31 }
  0x21   : > { %v171_v41 = vadd.f32 %v170_v37, %v169_v32  ;;  %v178_v42 = vadd.f32 %v177_v38, %v176_v33  ;;  %v185_v43 = vadd.f32 %v184_v39, %v183_v34 }
  0x23   : > { %v211_v47 = vsel %vm210_vm5, %v171_v41, %v178_v42 }
  0x24   : > { %v213_v48 = vsel %vm212_vm6, %v211_v47, %v185_v43 }
  0x25   : > { %v215_v49 = vsel %vm214_vm7, %v213_v48, %v193_v44 }
  0x26   : > { %v217_v50 = vsel %vm216_vm8, %v215_v49, %v201_v45 }
  0x27   : > { %v219_v51 = vsel %vm218_vm9, %v217_v50, %v209_v46 }
  0x28   : > { %v221_v52 = vsel %vm220_vm10, %v219_v51, 0.0 }
  0x29   : > { %222 = vst [vmem:[%s155_s20] sm:$0xff] %v221_v52 }
  0x2a PF: > { %s12_s9 = sadd.s32 1, %s316_s9  }
  0x2b   : > { %p9_p4 = scmp.ge.s32.totalorder %s12_s9, 4  }
  0x2d   :  { %11 = sbr.rel (!%p9_p4) target bundleno = 1 (0x1), region = 61 }

</bundles_post_ra>
